<compile_context>
chip_gen: v7x
topology: tpu7x:2x2x1
jax: 0.10.0
libtpu: 0.0.40
codegen_flags: <defaults>
</compile_context>

<pallas_src>
import jax
import jax.numpy as jnp
from jax.experimental import pallas as pl
from jax.experimental.pallas import tpu as pltpu

H1, H2, H3 = 128, 64, 32


def _round_up(n, m):
    return ((n + m - 1) // m) * m


def user_tower_kernel(x_ref, w1_ref, b1_ref, w2_ref, b2_ref, w3_ref, b3_ref, o_ref):
    # Layer 1: (tb, D) @ (D, 128) + (1, 128) -> ReLU   (f32 MXU accumulation)
    h = jnp.dot(x_ref[...], w1_ref[...], preferred_element_type=jnp.float32)
    h = jnp.maximum(h + b1_ref[...], 0.0)
    # Layer 2: (tb, 128) @ (128, 64) + (1, 64) -> ReLU
    h = jnp.dot(h, w2_ref[...], preferred_element_type=jnp.float32)
    h = jnp.maximum(h + b2_ref[...], 0.0)
    # Layer 3: (tb, 64) @ (64, 32) + (1, 32) -> ReLU
    h = jnp.dot(h, w3_ref[...], preferred_element_type=jnp.float32)
    o_ref[...] = jnp.maximum(h + b3_ref[...], 0.0).astype(o_ref.dtype)


def user_tower(x, params, *, tb=512):
    """x: (B, input_dim) float32. params: dict of W1,b1,W2,b2,W3,b3 (W is (in,out))."""
    B, D = x.shape
    w1, b1 = params["W1"], params["b1"]   # (D,128), (1,128)
    w2, b2 = params["W2"], params["b2"]   # (128,64), (1,64)
    w3, b3 = params["W3"], params["b3"]   # (64,32), (1,32)

    # Batch tile: big enough to fill the MXU M dimension and amortize per-step
    # grid overhead, multiple of 8 (sublane), never larger than the padded batch.
    tb = max(8, min(int(tb), _round_up(B, 8)))
    tb = _round_up(tb, 8)
    B_pad = _round_up(B, tb)
    if B_pad != B:
        # Zero-pad ragged batches; padded rows are sliced off after the call.
        x = jnp.pad(x, ((0, B_pad - B), (0, 0)))

    grid = (B_pad // tb,)

    # Advisory cost estimate for XLA scheduling around the custom call.
    flops = 2 * B_pad * (D * H1 + H1 * H2 + H2 * H3)
    bytes_accessed = 4 * (B_pad * D + B_pad * H3
                          + D * H1 + H1 + H1 * H2 + H2 + H2 * H3 + H3)
    cost = pl.CostEstimate(flops=flops, transcendentals=0,
                           bytes_accessed=bytes_accessed)

    out = pl.pallas_call(
        user_tower_kernel,
        out_shape=jax.ShapeDtypeStruct((B_pad, H3), jnp.float32),
        grid=grid,
        in_specs=[
            pl.BlockSpec((tb, D), lambda i: (i, 0)),       # x tile (streamed)
            pl.BlockSpec(w1.shape, lambda i: (0, 0)),      # W1 resident
            pl.BlockSpec(b1.shape, lambda i: (0, 0)),      # b1 resident
            pl.BlockSpec(w2.shape, lambda i: (0, 0)),      # W2 resident
            pl.BlockSpec(b2.shape, lambda i: (0, 0)),      # b2 resident
            pl.BlockSpec(w3.shape, lambda i: (0, 0)),      # W3 resident
            pl.BlockSpec(b3.shape, lambda i: (0, 0)),      # b3 resident
        ],
        out_specs=pl.BlockSpec((tb, H3), lambda i: (i, 0)),
        compiler_params=pltpu.CompilerParams(
            # Batch axis is independent -> shard across TensorCores (v7x megacore).
            dimension_semantics=("parallel",),
        ),
        cost_estimate=cost,
    )(x, w1, b1, w2, b2, w3, b3)

    return out[:B] if B_pad != B else out


def init_params(key, input_dim):
    """Deterministic synthetic parameters matching the PyTorch module shapes."""
    keys = jax.random.split(key, 6)

    def lin(kw, kb, fan_in, fan_out):
        bound = 1.0 / jnp.sqrt(fan_in)
        W = jax.random.uniform(kw, (fan_in, fan_out), jnp.float32, -bound, bound)
        b = jax.random.uniform(kb, (1, fan_out), jnp.float32, -bound, bound)
        return W, b

    W1, b1 = lin(keys[0], keys[1], input_dim, H1)
    W2, b2 = lin(keys[2], keys[3], H1, H2)
    W3, b3 = lin(keys[4], keys[5], H2, H3)
    return {"W1": W1, "b1": b1, "W2": W2, "b2": b2, "W3": W3, "b3": b3}


def user_tower_ref(x, p):
    h = jnp.maximum(x @ p["W1"] + p["b1"], 0.0)
    h = jnp.maximum(h @ p["W2"] + p["b2"], 0.0)
    return jnp.maximum(h @ p["W3"] + p["b3"], 0.0)


if __name__ == "__main__":
    key = jax.random.PRNGKey(0)
    k_x1, k_x2, k_p = jax.random.split(key, 3)

    input_dim = 32
    params = init_params(k_p, input_dim)

    # Small sanity case (tb auto-clamps to the batch, single grid step).
    x_small = jax.random.normal(k_x1, (8, input_dim), jnp.float32)
    out_small = jax.block_until_ready(user_tower(x_small, params))
    ref_small = user_tower_ref(x_small, params)
    assert out_small.shape == (8, H3)
    assert jnp.allclose(out_small, ref_small, atol=1e-4, rtol=1e-4), "mismatch (small)"

    # Ragged batch exercising zero-padding + a multi-step parallel grid.
    x_big = jax.random.normal(k_x2, (100, input_dim), jnp.float32)
    out_big = jax.block_until_ready(user_tower(x_big, params, tb=64))
    ref_big = user_tower_ref(x_big, params)
    assert out_big.shape == (100, H3)
    assert jnp.allclose(out_big, ref_big, atol=1e-4, rtol=1e-4), "mismatch (ragged)"

    print("KERNEL_OK")
</pallas_src>

<mosaic_0001>
module attributes {stable_mosaic.version = 11 : i64} {
  func.func @user_tower_kernel(%arg0: i32, %arg1: memref<8x32xf32, #tpu.memory_space<vmem>>, %arg2: memref<32x128xf32, #tpu.memory_space<vmem>>, %arg3: memref<1x128xf32, #tpu.memory_space<vmem>>, %arg4: memref<128x64xf32, #tpu.memory_space<vmem>>, %arg5: memref<1x64xf32, #tpu.memory_space<vmem>>, %arg6: memref<64x32xf32, #tpu.memory_space<vmem>>, %arg7: memref<1x32xf32, #tpu.memory_space<vmem>>, %arg8: memref<8x32xf32, #tpu.memory_space<vmem>>) attributes {dimension_semantics = [#tpu.dimension_semantics<parallel>], iteration_bounds = array<i64: 1>, scalar_prefetch = 0 : i64, scratch_operands = 0 : i64, tpu.core_type = #tpu.core_type<tc>, window_params = [{transform_indices = @transform_0, window_bounds = array<i64: 8, 32>}, {pipeline_mode = #tpu.pipeline_mode<synchronous>, transform_indices = @transform_1, window_bounds = array<i64: 32, 128>}, {pipeline_mode = #tpu.pipeline_mode<synchronous>, transform_indices = @transform_2, window_bounds = array<i64: 1, 128>}, {pipeline_mode = #tpu.pipeline_mode<synchronous>, transform_indices = @transform_3, window_bounds = array<i64: 128, 64>}, {pipeline_mode = #tpu.pipeline_mode<synchronous>, transform_indices = @transform_4, window_bounds = array<i64: 1, 64>}, {pipeline_mode = #tpu.pipeline_mode<synchronous>, transform_indices = @transform_5, window_bounds = array<i64: 64, 32>}, {pipeline_mode = #tpu.pipeline_mode<synchronous>, transform_indices = @transform_6, window_bounds = array<i64: 1, 32>}, {transform_indices = @transform_7, window_bounds = array<i64: 8, 32>}]} {
    %c0 = arith.constant 0 : index
    %c0_0 = arith.constant 0 : index
    %0 = vector.load %arg1[%c0, %c0_0] : memref<8x32xf32, #tpu.memory_space<vmem>>, vector<8x32xf32>
    %c0_1 = arith.constant 0 : index
    %c0_2 = arith.constant 0 : index
    %1 = vector.load %arg2[%c0_1, %c0_2] : memref<32x128xf32, #tpu.memory_space<vmem>>, vector<32x128xf32>
    %cst = arith.constant dense<0.000000e+00> : vector<8x128xf32>
    %2 = tpu.matmul %0, %1, %cst {dimension_numbers = #tpu.dot_dimension_numbers<[1], [0], [0], [1], [0, 0, 1, 1], [], []>} : vector<8x32xf32>, vector<32x128xf32>, vector<8x128xf32> -> vector<8x128xf32>
    %c0_3 = arith.constant 0 : index
    %c0_4 = arith.constant 0 : index
    %3 = vector.load %arg3[%c0_3, %c0_4] : memref<1x128xf32, #tpu.memory_space<vmem>>, vector<1x128xf32>
    %4 = vector.broadcast %3 : vector<1x128xf32> to vector<8x128xf32>
    %5 = arith.addf %2, %4 : vector<8x128xf32>
    %cst_5 = arith.constant 0.000000e+00 : f32
    %6 = vector.broadcast %cst_5 : f32 to vector<8x128xf32>
    %7 = arith.maximumf %5, %6 : vector<8x128xf32>
    %c0_6 = arith.constant 0 : index
    %c0_7 = arith.constant 0 : index
    %8 = vector.load %arg4[%c0_6, %c0_7] : memref<128x64xf32, #tpu.memory_space<vmem>>, vector<128x64xf32>
    %cst_8 = arith.constant dense<0.000000e+00> : vector<8x64xf32>
    %9 = tpu.matmul %7, %8, %cst_8 {dimension_numbers = #tpu.dot_dimension_numbers<[1], [0], [0], [1], [0, 0, 1, 1], [], []>} : vector<8x128xf32>, vector<128x64xf32>, vector<8x64xf32> -> vector<8x64xf32>
    %c0_9 = arith.constant 0 : index
    %c0_10 = arith.constant 0 : index
    %10 = vector.load %arg5[%c0_9, %c0_10] : memref<1x64xf32, #tpu.memory_space<vmem>>, vector<1x64xf32>
    %11 = vector.broadcast %10 : vector<1x64xf32> to vector<8x64xf32>
    %12 = arith.addf %9, %11 : vector<8x64xf32>
    %cst_11 = arith.constant 0.000000e+00 : f32
    %13 = vector.broadcast %cst_11 : f32 to vector<8x64xf32>
    %14 = arith.maximumf %12, %13 : vector<8x64xf32>
    %c0_12 = arith.constant 0 : index
    %c0_13 = arith.constant 0 : index
    %15 = vector.load %arg6[%c0_12, %c0_13] : memref<64x32xf32, #tpu.memory_space<vmem>>, vector<64x32xf32>
    %cst_14 = arith.constant dense<0.000000e+00> : vector<8x32xf32>
    %16 = tpu.matmul %14, %15, %cst_14 {dimension_numbers = #tpu.dot_dimension_numbers<[1], [0], [0], [1], [0, 0, 1, 1], [], []>} : vector<8x64xf32>, vector<64x32xf32>, vector<8x32xf32> -> vector<8x32xf32>
    %c0_15 = arith.constant 0 : index
    %c0_16 = arith.constant 0 : index
    %17 = vector.load %arg7[%c0_15, %c0_16] : memref<1x32xf32, #tpu.memory_space<vmem>>, vector<1x32xf32>
    %18 = vector.broadcast %17 : vector<1x32xf32> to vector<8x32xf32>
    %19 = arith.addf %16, %18 : vector<8x32xf32>
    %cst_17 = arith.constant 0.000000e+00 : f32
    %20 = vector.broadcast %cst_17 : f32 to vector<8x32xf32>
    %21 = arith.maximumf %19, %20 : vector<8x32xf32>
    %c0_18 = arith.constant 0 : index
    %c0_19 = arith.constant 0 : index
    %22 = vector.load %arg8[%c0_18, %c0_19] : memref<8x32xf32, #tpu.memory_space<vmem>>, vector<8x32xf32>
    tpu.vector_store %arg8[%c0_18, %c0_19], %21 {strides = array<i32>} : memref<8x32xf32, #tpu.memory_space<vmem>>, vector<8x32xf32>,
    return
  }
  func.func @transform_0(%arg0: i32) -> (i32, i32) {
    %c0_i32 = arith.constant 0 : i32
    %c0_i32_0 = arith.constant 0 : i32
    return %arg0, %c0_i32 : i32, i32
  }
  func.func @transform_1(%arg0: i32) -> (i32, i32) {
    %c0_i32 = arith.constant 0 : i32
    %c0_i32_0 = arith.constant 0 : i32
    %c0_i32_1 = arith.constant 0 : i32
    return %c0_i32, %c0_i32_0 : i32, i32
  }
  func.func @transform_2(%arg0: i32) -> (i32, i32) {
    %c0_i32 = arith.constant 0 : i32
    %c0_i32_0 = arith.constant 0 : i32
    %c0_i32_1 = arith.constant 0 : i32
    return %c0_i32, %c0_i32_0 : i32, i32
  }
  func.func @transform_3(%arg0: i32) -> (i32, i32) {
    %c0_i32 = arith.constant 0 : i32
    %c0_i32_0 = arith.constant 0 : i32
    %c0_i32_1 = arith.constant 0 : i32
    return %c0_i32, %c0_i32_0 : i32, i32
  }
  func.func @transform_4(%arg0: i32) -> (i32, i32) {
    %c0_i32 = arith.constant 0 : i32
    %c0_i32_0 = arith.constant 0 : i32
    %c0_i32_1 = arith.constant 0 : i32
    return %c0_i32, %c0_i32_0 : i32, i32
  }
  func.func @transform_5(%arg0: i32) -> (i32, i32) {
    %c0_i32 = arith.constant 0 : i32
    %c0_i32_0 = arith.constant 0 : i32
    %c0_i32_1 = arith.constant 0 : i32
    return %c0_i32, %c0_i32_0 : i32, i32
  }
  func.func @transform_6(%arg0: i32) -> (i32, i32) {
    %c0_i32 = arith.constant 0 : i32
    %c0_i32_0 = arith.constant 0 : i32
    %c0_i32_1 = arith.constant 0 : i32
    return %c0_i32, %c0_i32_0 : i32, i32
  }
  func.func @transform_7(%arg0: i32) -> (i32, i32) {
    %c0_i32 = arith.constant 0 : i32
    %c0_i32_0 = arith.constant 0 : i32
    return %arg0, %c0_i32 : i32, i32
  }
}

</mosaic_0001>

<bundles_post_ra>
// kernel: tpu_custom_call.1
= control target key start
LH: loop header
LB: loop body
LE: loop exit
PB: predicated region body
PF: predicated region fallthrough
CT: control target
= control target key end

     0   :  { %v484_v3 = vmov 0.0|0.0   ;;  %vm485_vm0 = vmmov 0   ;;  %v486_v6 = vmov 0.0   ;;  %s655_s0 = inlined_call_operand.vmem [shape: f32[8,32], index: 0, kind: input, shape index: {}]   ;;  %s656_s1 = inlined_call_operand.vmem [shape: f32[32,128], index: 1, kind: input, shape index: {}]   ;;  %s657_s2 = inlined_call_operand.vmem [shape: f32[1,128], index: 2, kind: input, shape index: {}]   ;;  %s658_s3 = inlined_call_operand.vmem [shape: f32[128,64], index: 3, kind: input, shape index: {}]   ;;  %s659_s4 = inlined_call_operand.vmem [shape: f32[1,64], index: 4, kind: input, shape index: {}]   ;;  %s660_s5 = inlined_call_operand.vmem [shape: f32[64,32], index: 5, kind: input, shape index: {}]   ;;  %s661_s6 = inlined_call_operand.vmem [shape: f32[1,32], index: 6, kind: input, shape index: {}]   ;;  %s662_s7 = inlined_call_operand.hbm [shape: f32[8,32], index: 7, kind: output, shape index: {}]  }
   0x1   :  { %v28_v0 = vld [vmem:[%s656_s1] sm:$0xff]  ;;  %v29_v1 = vld [vmem:[%s656_s1 + $0x8] sm:$0xff]  ;;  %v30_v2 = vld [vmem:[%s656_s1 + $0x10] sm:$0xff]  ;;  %414 = vmatprep.subr.bf16.mxu0 %v484_v3  ;;  %357 = vmatprep.mubr.msk.f32.mxu0 %vm485_vm0, %v486_v6 }
   0x2   :  { %v415_v4 = vpack.c.bf16 %v29_v1, %v28_v0  ;;  %v31_v5 = vld [vmem:[%s656_s1 + $0x18] sm:$0xff]  ;;  %v114_v7 = vld [vmem:[%s658_s3] sm:$0xff]  ;;  %420 = vmatprep.subr.bf16.mxu1 %v484_v3  ;;  %v115_v8 = vld [vmem:[%s658_s3 + $0x8] sm:$0xff]  ;;  %392 = vmatprep.mubr.msk.f32.mxu1 %vm485_vm0, %v486_v6 }
   0x3   :  { %v116_v9 = vld [vmem:[%s658_s3 + $0x10] sm:$0xff]  ;;  %v117_v10 = vld [vmem:[%s658_s3 + $0x18] sm:$0xff]  ;;  %v418_v11 = vpack.c.bf16 %v31_v5, %v30_v2  ;;  %v421_v12 = vpack.c.bf16 %v115_v8, %v114_v7  ;;  %v118_v14 = vld [vmem:[%s658_s3 + $0x20] sm:$0xff] }
   0x4   :  { %416 = vmatpush3.bf16.msra.mxu0 %v415_v4  ;;  %v424_v13 = vpack.c.bf16 %v117_v10, %v116_v9  ;;  %v119_v15 = vld [vmem:[%s658_s3 + $0x28] sm:$0xff] }
   0x5   :  { %417 = vmatprep.subr.bf16.mxu0 %v484_v3  ;;  %422 = vmatpush3.bf16.msra.mxu1 %v421_v12 }
   0x6   :  { %423 = vmatprep.subr.bf16.mxu1 %v484_v3 }
   0x7   :  { %12 = vsyncpa [#allocation3], 0  ;;  %v27_v16 = vld [vmem:[%s655_s0] sm:$0xff]  ;;  %vm39_vm1 = vcmask 261120   ;;  %v427_v17 = vpack.c.bf16 %v119_v15, %v118_v14  ;;  %v120_v18 = vld [vmem:[%s658_s3 + $0x30] sm:$0xff]  ;;  %vm223_vm2 = vcmask 523264  }
   0x8   :  { %419 = vmatpush3.bf16.msra.mxu0 %v418_v11  ;;  %v121_v19 = vld [vmem:[%s658_s3 + $0x38] sm:$0xff]  ;;  %v122_v21 = vld [vmem:[%s658_s3 + $0x40] sm:$0xff]  ;;  %v123_v22 = vld [vmem:[%s658_s3 + $0x48] sm:$0xff]  ;;  %s487_s13 = smov [#allocation2]  }
   0x9   :  { %444 = vmatprep.subr.bf16.mxu0 %v484_v3  ;;  %425 = vmatpush3.bf16.msra.mxu1 %v424_v13  ;;  %v430_v20 = vpack.c.bf16 %v121_v19, %v120_v18  ;;  %v433_v23 = vpack.c.bf16 %v123_v22, %v122_v21  ;;  %v124_v24 = vld [vmem:[%s658_s3 + $0x50] sm:$0xff]  ;;  %v125_v25 = vld [vmem:[%s658_s3 + $0x58] sm:$0xff]  ;;  %v126_v27 = vld [vmem:[%s658_s3 + $0x60] sm:$0xff]  ;;  %s305_s14 = sshll.u32 %s487_s13, 4  ;;  %s306_s14 = int_to_ptr.vmem [resolvable:$true] %s305_s14 }
   0xa   :  { %426 = vmatprep.subr.bf16.mxu1 %v484_v3  ;;  %v436_v26 = vpack.c.bf16 %v125_v25, %v124_v24  ;;  %v127_v28 = vld [vmem:[%s658_s3 + $0x68] sm:$0xff]  ;;  %v128_v30 = vld [vmem:[%s658_s3 + $0x70] sm:$0xff]  ;;  %v129_v31 = vld [vmem:[%s658_s3 + $0x78] sm:$0xff]  ;;  %p465_p1 = scmp.lt.s32.totalorder %s306_s14, %s306_s14 }
   0xb   :  { %358 = vmatmul.mubr.msk.f32.vlgmr.msra.gmra.mrb[0].mxu0 %vm39_vm1, %v27_v16  ;;  %v439_v29 = vpack.c.bf16 %v127_v28, %v126_v27  ;;  %v442_v32 = vpack.c.bf16 %v129_v31, %v128_v30  ;;  %v208_v33 = vld [vmem:[%s660_s5] sm:$0xff]  ;;  %v209_v34 = vld [vmem:[%s660_s5 + $0x8] sm:$0xff]  ;;  %v210_v35 = vld [vmem:[%s660_s5 + $0x10] sm:$0xff] }
   0xc   :  { %411 = vmatprep.mubr.msk.f32.mxu0 %vm485_vm0, %v486_v6  ;;  %v445_v36 = vpack.c.bf16 %v209_v34, %v208_v33  ;;  %v211_v37 = vld [vmem:[%s660_s5 + $0x18] sm:$0xff]  ;;  %v212_v39 = vld [vmem:[%s660_s5 + $0x20] sm:$0xff]  ;;  %v213_v40 = vld [vmem:[%s660_s5 + $0x28] sm:$0xff] }
   0xd   :  { %428 = vmatpush3.bf16.msra.mxu1 %v427_v17  ;;  %v448_v38 = vpack.c.bf16 %v211_v37, %v210_v35  ;;  %v451_v41 = vpack.c.bf16 %v213_v40, %v212_v39  ;;  %v313_v42 = vld [vmem:[%s657_s2] ss:$0 sm:$0xff]  ;;  %v214_v47 = vld [vmem:[%s660_s5 + $0x30] sm:$0xff]  ;;  %v215_v48 = vld [vmem:[%s660_s5 + $0x38] sm:$0xff] }
   0xe   :  { %429 = vmatprep.subr.bf16.mxu1 %v484_v3  ;;  %446 = vmatpush3.bf16.msra.mxu0 %v445_v36  ;;  %v454_v49 = vpack.c.bf16 %v215_v48, %v214_v47  ;;  %v315_v50 = vld [vmem:[%s659_s4] ss:$0 sm:$0xff]  ;;  %s460_s4 = scalar_lea.vmem %s306_s14, 128 }
   0xf   :  { %447 = vmatprep.subr.bf16.mxu0 %v484_v3  ;;  %v316_v55 = vld [vmem:[%s661_s6] ss:$0 sm:$0xff]  ;;  %p461_p0 = scmp.ne.s32.totalorder %s306_s14, %s460_s4  ;;  %p466_p2 = scmp.lt.s32.totalorder %s460_s4, %s460_s4 }
  0x11   :  { %431 = vmatpush3.bf16.msra.mxu1 %v430_v20  ;;  %p467_p3 = por %p466_p2, %p465_p1 }
  0x12   :  { %432 = vmatprep.subr.bf16.mxu1 %v484_v3  ;;  %449 = vmatpush3.bf16.msra.mxu0 %v448_v38 }
  0x13   :  { %450 = vmatprep.subr.bf16.mxu0 %v484_v3  ;;  %p468_p4 = pnand %p467_p3, %p461_p0 }
  0x15   :  { %434 = vmatpush3.bf16.msra.mxu1 %v433_v23 }
  0x16   :  { %435 = vmatprep.subr.bf16.mxu1 %v484_v3  ;;  %452 = vmatpush3.bf16.msra.mxu0 %v451_v41 }
  0x17   :  { %453 = vmatprep.subr.bf16.mxu0 %v484_v3 }
  0x19   :  { %437 = vmatpush3.bf16.msra.mxu1 %v436_v26 }
  0x1a   :  { %438 = vmatprep.subr.bf16.mxu1 %v484_v3  ;;  %455 = vmatpush3.bf16.msra.mxu0 %v454_v49 }
  0x1d   :  { %440 = vmatpush3.bf16.msra.mxu1 %v439_v29 }
  0x1e   :  { %441 = vmatprep.subr.bf16.mxu1 %v484_v3 }
  0x21   :  { %443 = vmatpush3.bf16.msra.mxu1 %v442_v32 }
  0xde   :  { %v109_v43 = vpop.f32.mrb[0].mxu0 }
  0xdf   :  { %v110_v44 = vadd.f32 %v313_v42, %v109_v43  ;;  %v359_v45 = vpop.f32.mrb[1].mxu0 }
  0xe1   :  { %v113_v46 = vmax.f32 %v110_v44, 0.0 }
  0xe3   :  { %393 = vmatmul.mubr.f32.vlgmr.msra.gmra.mrb[0].mxu1 %v113_v46 }
 0x1b6   :  { %v203_v51 = vpop.f32.mrb[0].mxu1 }
 0x1b7   :  { %v204_v52 = vadd.f32 %v315_v50, %v203_v51  ;;  %v394_v53 = vpop.f32.mrb[1].mxu1 }
 0x1b9   :  { %v207_v54 = vmax.f32 %v204_v52, 0.0 }
 0x1bb   :  { %412 = vmatmul.mubr.msk.f32.vlgmr.msra.gmra.mrb[2].mxu0 %vm223_vm2, %v207_v54 }
 0x28e   :  { %v293_v56 = vpop.f32.mrb[2].mxu0 }
 0x28f   :  { %v294_v57 = vadd.f32 %v316_v55, %v293_v56  ;;  %v413_v58 = vpop.f32.mrb[3].mxu0 }
 0x291   :  { %v297_v59 = vmax.f32 %v294_v57, 0.0 }
 0x293   :  { %298 = vst.msk [vmem:[#allocation2] sm:$0xff] %vm39_vm1, %v297_v59 }
 0x294   :  { %471 = shalt.err (!%p468_p4)
}
 0x295   :  { %s472_s6 = scalar_lea.hbm %s662_s7, 128 }
 0x296   :  { %p473_p5 = scmp.ne.s32.totalorder %s662_s7, %s472_s6  ;;  %p476_p6 = scmp.lt.u32.totalorder %s472_s6, %s662_s7 }
 0x298   :  { %p478_p7 = pnand %p476_p6, %p473_p5 }
 0x29a   :  { %481 = shalt.err (!%p478_p7)
}
 0x29b   :  { %308 = dma.vmem_to_hbm [thread:$0]  %s306_s14, 128, %s662_s7, [#allocation3]  }
 0x29c   :  { %482 = dma.done.wait [#allocation3], 128  }
 0x29d   :  { %483 = vsyncadd [#allocation3], 4294967168 }
 0x29e   :  { %312 = vsyncpa [#allocation3], 1 }

</bundles_post_ra>
